<compile_context>
chip_gen: v5e
topology: v5e:2x2
jax: 0.10.0
libtpu: 0.0.40
codegen_flags: <defaults>
</compile_context>

<pallas_src>
import jax
import jax.numpy as jnp
from jax.experimental import pallas as pl
from jax.experimental.pallas import tpu as pltpu

LATENT_SPACE = 2
COND_DIM = 10
IN_DIM = LATENT_SPACE + COND_DIM   # 12
DIM1 = 512
OUT_DIM = 784
OUT_PAD = 1024                     # 8 * 128: lane-aligned, clean 256-wide MXU N tiles
N_TILE = 512                       # output-column tile (2 tiles -> >=2 grid steps)
MAX_TB = 1024                      # batch-tile ceiling for large batches


def _round_up(x, m):
    return (x + m - 1) // m * m


def cvae_decoder_kernel(zc_ref, w1_ref, b1_ref, w2_ref, b2_ref, out_ref):
    """One (batch tile, output-column tile) of the decoder forward pass.

    zc_ref : (TB, 12)    compute dtype (bf16 default / f32 verification)
    w1_ref : (12, 512)   compute dtype   (VMEM-resident across grid steps)
    b1_ref : (1, 512)    f32             (resident)
    w2_ref : (512, 512)  compute dtype   (current N tile of the padded 1024)
    b2_ref : (1, 512)    f32             (current N tile)
    out_ref: (TB, 512)   bf16 default / f32 verification
    """
    # Layer 1: Linear + ReLU.  MXU matmul with f32 accumulation; bias add and
    # ReLU are whole-tile f32 VPU ops.  (Recomputed per N tile: 2*TB*12*512
    # extra flops, negligible vs layer 2.)
    h = jnp.dot(zc_ref[...], w1_ref[...], preferred_element_type=jnp.float32)
    h = jnp.maximum(h + b1_ref[...], 0.0)

    # Output layer: Linear + Sigmoid on a lane-dense 512-wide N tile.
    y = jnp.dot(h.astype(w2_ref.dtype), w2_ref[...],
                preferred_element_type=jnp.float32)
    y = y + b2_ref[...]
    # sigmoid(y) == 0.5*tanh(0.5*y) + 0.5 : one EUP op/element (vs exp + div).
    out_ref[...] = (0.5 * jnp.tanh(0.5 * y) + 0.5).astype(out_ref.dtype)


def prepare_params(w1, b1, w2, b2, *, compute_dtype=jnp.bfloat16):
    """One-time parameter packing (cast + feature pad), hoisted out of forward."""
    w1_c = jnp.asarray(w1, compute_dtype)
    b1_c = jnp.asarray(b1, jnp.float32).reshape(1, DIM1)
    w2_p = jnp.zeros((DIM1, OUT_PAD), compute_dtype).at[:, :OUT_DIM].set(
        jnp.asarray(w2, compute_dtype))
    b2_p = jnp.zeros((1, OUT_PAD), jnp.float32).at[:, :OUT_DIM].set(
        jnp.asarray(b2, jnp.float32).reshape(1, OUT_DIM))
    return w1_c, b1_c, w2_p, b2_p


def cvae_decoder_forward_padded(zc, params):
    """zc: (B, 12). Returns the lane-padded (B_pad, 1024) output slab.

    Padded batch rows are zeros (wasted-but-cheap compute); padded feature
    columns come out as sigmoid(0) = 0.5.  Strip both at the consumer.
    """
    w1_c, b1_c, w2_p, b2_p = params
    compute_dtype = w1_c.dtype
    out_dtype = jnp.bfloat16 if compute_dtype == jnp.bfloat16 else jnp.float32

    B = zc.shape[0]
    # Batch tile: multiple of 16 (bf16 sublane packing), capped at MAX_TB so
    # resident weights + double-buffered activations stay a few MB of VMEM.
    TB = min(_round_up(B, 16), MAX_TB)
    B_pad = _round_up(B, TB)
    nb = B_pad // TB
    n_tiles = OUT_PAD // N_TILE

    if B_pad == B and zc.dtype == compute_dtype:
        zc_p = zc
    else:
        zc_p = jnp.zeros((B_pad, IN_DIM), compute_dtype).at[:B].set(
            zc.astype(compute_dtype))

    cost = pl.CostEstimate(
        flops=2 * B_pad * (IN_DIM * DIM1 * n_tiles + DIM1 * OUT_PAD),
        bytes_accessed=(zc_p.size * zc_p.dtype.itemsize
                        + nb * (w1_c.size * w1_c.dtype.itemsize
                                + w2_p.size * w2_p.dtype.itemsize
                                + b1_c.size * 4 + b2_p.size * 4)
                        + B_pad * OUT_PAD * jnp.dtype(out_dtype).itemsize),
        transcendentals=B_pad * OUT_PAD,   # one tanh per element
    )

    return pl.pallas_call(
        cvae_decoder_kernel,
        out_shape=jax.ShapeDtypeStruct((B_pad, OUT_PAD), out_dtype),
        grid=(nb, n_tiles),
        in_specs=[
            pl.BlockSpec((TB, IN_DIM), lambda i, j: (i, 0)),     # zc batch tile
            pl.BlockSpec((IN_DIM, DIM1), lambda i, j: (0, 0)),   # w1 (resident)
            pl.BlockSpec((1, DIM1), lambda i, j: (0, 0)),        # b1 (resident)
            pl.BlockSpec((DIM1, N_TILE), lambda i, j: (0, j)),   # w2 N tile
            pl.BlockSpec((1, N_TILE), lambda i, j: (0, j)),      # b2 N tile
        ],
        out_specs=pl.BlockSpec((TB, N_TILE), lambda i, j: (i, j)),
        compiler_params=pltpu.CompilerParams(
            # Both axes independent: v7x shards across its 2 TCs (>=2 steps
            # guaranteed by the N split); harmless loop on v5e/v6e.
            dimension_semantics=("parallel", "parallel"),
            # Explicit limit so v5e's 16 MiB scoped default never blocks TB=1024.
            vmem_limit_bytes=32 << 20,
        ),
        cost_estimate=cost,
    )(zc_p, w1_c, b1_c, w2_p, b2_p)


def cvae_decoder_forward(zc, params):
    """Module-equivalent output (B, 784) f32.

    Note: prefer cvae_decoder_forward_padded + slicing (or fusing) at the
    consumer when this feeds further compute — the slice here is an extra
    HBM->HBM pass kept only for exact nn.Module output shape/dtype parity.
    """
    out_p = cvae_decoder_forward_padded(zc, params)
    return out_p[:zc.shape[0], :OUT_DIM].astype(jnp.float32)


def init_params(key):
    """Deterministic init (PyTorch-style uniform(-1/sqrt(fan_in), +))."""
    k1, k2, k3, k4 = jax.random.split(key, 4)
    bound1 = 1.0 / jnp.sqrt(IN_DIM)
    bound2 = 1.0 / jnp.sqrt(DIM1)
    w1 = jax.random.uniform(k1, (IN_DIM, DIM1), jnp.float32, -bound1, bound1)
    b1 = jax.random.uniform(k2, (DIM1,), jnp.float32, -bound1, bound1)
    w2 = jax.random.uniform(k3, (DIM1, OUT_DIM), jnp.float32, -bound2, bound2)
    b2 = jax.random.uniform(k4, (OUT_DIM,), jnp.float32, -bound2, bound2)
    return w1, b1, w2, b2


def reference_forward(zc, w1, b1, w2, b2):
    h = jnp.maximum(zc @ w1 + b1, 0.0)
    return jax.nn.sigmoid(h @ w2 + b2)


if __name__ == "__main__":
    key = jax.random.PRNGKey(0)
    kp, kx = jax.random.split(key)
    w1, b1, w2, b2 = init_params(kp)

    batch = 2
    # zc = concat([latent (2,), one-hot condition (10,)]) per sample -> (B, 12)
    zc = jax.random.normal(kx, (batch, IN_DIM), jnp.float32)

    ref = reference_forward(zc, w1, b1, w2, b2)

    # f32 path: tight-tolerance correctness check.
    params_f32 = prepare_params(w1, b1, w2, b2, compute_dtype=jnp.float32)
    out_f32 = jax.block_until_ready(cvae_decoder_forward(zc, params_f32))
    assert out_f32.shape == (batch, OUT_DIM), out_f32.shape
    assert jnp.allclose(out_f32, ref, atol=1e-4, rtol=1e-4), "f32 mismatch vs reference"

    # bf16-MXU path (default): f32 accumulation, bf16 output, loose tolerance.
    params = prepare_params(w1, b1, w2, b2)
    out_pad = jax.block_until_ready(cvae_decoder_forward_padded(zc, params))
    assert out_pad.shape[1] == OUT_PAD and out_pad.dtype == jnp.bfloat16
    out = out_pad[:batch, :OUT_DIM].astype(jnp.float32)
    assert out.shape == (batch, OUT_DIM), out.shape
    assert jnp.allclose(out, ref, atol=2e-2, rtol=2e-2), "bf16 mismatch vs reference"

    print("KERNEL_OK")
</pallas_src>

<mosaic_0001>
module attributes {stable_mosaic.version = 11 : i64} {
  func.func @cvae_decoder_kernel(%arg0: i32, %arg1: i32, %arg2: memref<16x12xf32, #tpu.memory_space<vmem>>, %arg3: memref<12x512xf32, #tpu.memory_space<vmem>>, %arg4: memref<1x512xf32, #tpu.memory_space<vmem>>, %arg5: memref<512x512xf32, #tpu.memory_space<vmem>>, %arg6: memref<1x512xf32, #tpu.memory_space<vmem>>, %arg7: memref<16x512xf32, #tpu.memory_space<vmem>>) attributes {dimension_semantics = [#tpu.dimension_semantics<parallel>, #tpu.dimension_semantics<parallel>], iteration_bounds = array<i64: 1, 2>, scalar_prefetch = 0 : i64, scratch_operands = 0 : i64, tpu.core_type = #tpu.core_type<tc>, window_params = [{transform_indices = @transform_0, window_bounds = array<i64: 16, 12>}, {pipeline_mode = #tpu.pipeline_mode<synchronous>, transform_indices = @transform_1, window_bounds = array<i64: 12, 512>}, {pipeline_mode = #tpu.pipeline_mode<synchronous>, transform_indices = @transform_2, window_bounds = array<i64: 1, 512>}, {transform_indices = @transform_3, window_bounds = array<i64: 512, 512>}, {transform_indices = @transform_4, window_bounds = array<i64: 1, 512>}, {transform_indices = @transform_5, window_bounds = array<i64: 16, 512>}]} {
    %c0 = arith.constant 0 : index
    %c0_0 = arith.constant 0 : index
    %0 = vector.load %arg2[%c0, %c0_0] : memref<16x12xf32, #tpu.memory_space<vmem>>, vector<16x12xf32>
    %c0_1 = arith.constant 0 : index
    %c0_2 = arith.constant 0 : index
    %1 = vector.load %arg3[%c0_1, %c0_2] : memref<12x512xf32, #tpu.memory_space<vmem>>, vector<12x512xf32>
    %cst = arith.constant dense<0.000000e+00> : vector<16x512xf32>
    %2 = tpu.matmul %0, %1, %cst {dimension_numbers = #tpu.dot_dimension_numbers<[1], [0], [0], [1], [0, 0, 1, 1], [], []>} : vector<16x12xf32>, vector<12x512xf32>, vector<16x512xf32> -> vector<16x512xf32>
    %c0_3 = arith.constant 0 : index
    %c0_4 = arith.constant 0 : index
    %3 = vector.load %arg4[%c0_3, %c0_4] : memref<1x512xf32, #tpu.memory_space<vmem>>, vector<1x512xf32>
    %4 = vector.broadcast %3 : vector<1x512xf32> to vector<16x512xf32>
    %5 = arith.addf %2, %4 : vector<16x512xf32>
    %cst_5 = arith.constant 0.000000e+00 : f32
    %6 = vector.broadcast %cst_5 : f32 to vector<16x512xf32>
    %7 = arith.maximumf %5, %6 : vector<16x512xf32>
    %c0_6 = arith.constant 0 : index
    %c0_7 = arith.constant 0 : index
    %8 = vector.load %arg5[%c0_6, %c0_7] : memref<512x512xf32, #tpu.memory_space<vmem>>, vector<512x512xf32>
    %cst_8 = arith.constant dense<0.000000e+00> : vector<16x512xf32>
    %9 = tpu.matmul %7, %8, %cst_8 {dimension_numbers = #tpu.dot_dimension_numbers<[1], [0], [0], [1], [0, 0, 1, 1], [], []>} : vector<16x512xf32>, vector<512x512xf32>, vector<16x512xf32> -> vector<16x512xf32>
    %c0_9 = arith.constant 0 : index
    %c0_10 = arith.constant 0 : index
    %10 = vector.load %arg6[%c0_9, %c0_10] : memref<1x512xf32, #tpu.memory_space<vmem>>, vector<1x512xf32>
    %11 = vector.broadcast %10 : vector<1x512xf32> to vector<16x512xf32>
    %12 = arith.addf %9, %11 : vector<16x512xf32>
    %cst_11 = arith.constant 5.000000e-01 : f32
    %13 = vector.broadcast %cst_11 : f32 to vector<16x512xf32>
    %14 = arith.mulf %13, %12 : vector<16x512xf32>
    %15 = math.tanh %14 : vector<16x512xf32>
    %cst_12 = arith.constant 5.000000e-01 : f32
    %16 = vector.broadcast %cst_12 : f32 to vector<16x512xf32>
    %17 = arith.mulf %16, %15 : vector<16x512xf32>
    %cst_13 = arith.constant 5.000000e-01 : f32
    %18 = vector.broadcast %cst_13 : f32 to vector<16x512xf32>
    %19 = arith.addf %17, %18 : vector<16x512xf32>
    %c0_14 = arith.constant 0 : index
    %c0_15 = arith.constant 0 : index
    %20 = vector.load %arg7[%c0_14, %c0_15] : memref<16x512xf32, #tpu.memory_space<vmem>>, vector<16x512xf32>
    tpu.vector_store %arg7[%c0_14, %c0_15], %19 {strides = array<i32>} : memref<16x512xf32, #tpu.memory_space<vmem>>, vector<16x512xf32>,
    return
  }
  func.func @transform_0(%arg0: i32, %arg1: i32) -> (i32, i32) {
    %c0_i32 = arith.constant 0 : i32
    %c0_i32_0 = arith.constant 0 : i32
    return %arg0, %c0_i32 : i32, i32
  }
  func.func @transform_1(%arg0: i32, %arg1: i32) -> (i32, i32) {
    %c0_i32 = arith.constant 0 : i32
    %c0_i32_0 = arith.constant 0 : i32
    %c0_i32_1 = arith.constant 0 : i32
    return %c0_i32, %c0_i32_0 : i32, i32
  }
  func.func @transform_2(%arg0: i32, %arg1: i32) -> (i32, i32) {
    %c0_i32 = arith.constant 0 : i32
    %c0_i32_0 = arith.constant 0 : i32
    %c0_i32_1 = arith.constant 0 : i32
    return %c0_i32, %c0_i32_0 : i32, i32
  }
  func.func @transform_3(%arg0: i32, %arg1: i32) -> (i32, i32) {
    %c0_i32 = arith.constant 0 : i32
    %c0_i32_0 = arith.constant 0 : i32
    return %c0_i32, %arg1 : i32, i32
  }
  func.func @transform_4(%arg0: i32, %arg1: i32) -> (i32, i32) {
    %c0_i32 = arith.constant 0 : i32
    %c0_i32_0 = arith.constant 0 : i32
    return %c0_i32, %arg1 : i32, i32
  }
  func.func @transform_5(%arg0: i32, %arg1: i32) -> (i32, i32) {
    %c0_i32 = arith.constant 0 : i32
    return %arg0, %arg1 : i32, i32
  }
}

</mosaic_0001>

<bundles_post_ra>
// kernel: tpu_custom_call.1
= control target key start
LH: loop header
LB: loop body
LE: loop exit
PB: predicated region body
PF: predicated region fallthrough
CT: control target
= control target key end

     0   :  { %s2287_s0 = inlined_call_operand.hbm [shape: f32[16,12], index: 0, kind: input, shape index: {}]   ;;  %s2288_s1 = inlined_call_operand.hbm [shape: f32[12,512], index: 1, kind: input, shape index: {}]   ;;  %s2289_s2 = inlined_call_operand.hbm [shape: f32[1,512], index: 2, kind: input, shape index: {}]   ;;  %s2290_s3 = inlined_call_operand.hbm [shape: f32[512,1024], index: 3, kind: input, shape index: {}]   ;;  %s2291_s4 = inlined_call_operand.hbm [shape: f32[1,1024], index: 4, kind: input, shape index: {}]   ;;  %s2292_s5 = inlined_call_operand.hbm [shape: f32[16,1024], index: 5, kind: output, shape index: {}]  }
   0x1   :  { %2301 = sst [smem:[#allocation22_spill]] %s2287_s0 }
   0x2   :  { %2302 = sst [smem:[#allocation23_spill]] %s2288_s1 }
   0x3   :  { %2303 = sst [smem:[#allocation24_spill]] %s2290_s3 }
   0x4   :  { %10 = vsyncpa [#allocation3], 0 }
   0x5   :  { %11 = vsyncpa [#allocation6], 0 }
   0x6   :  { %12 = vsyncpa [#allocation9], 0 }
   0x7   :  { %14 = vsyncpa [#allocation9 + $0x1], 0 }
   0x8   :  { %15 = vsyncpa [#allocation4], 0 }
   0x9   :  { %17 = vsyncpa [#allocation4 + $0x1], 0  ;;  %s1769_s18 = smov 0   ;;  %s1771_s19 = smov 0  }
   0xa   :  { %s1773_s20 = smov 0   ;;  %s1775_s21 = smov 0  }
   0xb   :  { %s1777_s22 = smov 0   ;;  %s1779_s23 = smov 0  }
   0xc LB: > { %2304 = sst [smem:[#allocation16_spill]] %s1706_s18  ;;  %s1800_s24 = sadd.s32 4294967295, %s1726_s23   ;;  %s1726_s23 = sphi %s1779_s23, %s23_s23   ;;  %s1722_s22 = sphi %s1777_s22, %s2331_s22   ;;  %s1718_s21 = sphi %s1775_s21, %s2330_s21   ;;  %s1714_s20 = sphi %s1773_s20, %s2326_s20   ;;  %s1710_s19 = sphi %s1771_s19, %s2329_s19   ;;  %s1706_s18 = sphi %s1769_s18, %s2328_s18  }
   0xd   : > { %2305 = sst [smem:[#allocation17_spill]] %s1714_s20  ;;  %s1327_s25 = sadd.s32 4294967294, %s1726_s23  }
   0xe   : > { %2306 = sst [smem:[#allocation18_spill]] %s1726_s23  ;;  %p123_p0 = scmp.ne.s32.totalorder %s1710_s19, %s1706_s18 }
   0xf   : > { %p124_p1 = scmp.eq.s32.totalorder %s1800_s24, 0  ;;  %p175_p2 = scmp.eq.s32.totalorder %s1800_s24, 1 }
  0x10   : > { %p181_p3 = scmp.eq.s32.totalorder %s1327_s25, 1  ;;  %p1328_p5 = scmp.ge.s32.totalorder %s1726_s23, 1 }
  0x11   : > { %p1809_p4 = por %p124_p1, %p123_p0  ;;  %p188_p7 = scmp.lt.s32.totalorder %s1726_s23, 3 }
  0x12   : > { %p1814_p6 = por %p181_p3, %p123_p0  ;;  %s2310_s1 = sld [smem:[#allocation23_spill]] }
  0x13   : > { %p1822_p8 = pnand %p1328_p5, %p188_p7  ;;  %s1728_s7 = smov [#allocation5]  }
  0x14   : > { %s2308_s27 = scalar_select %p1814_p6, 1, 0 }
  0x15   : > { %p1382_p9 = pneg %p1822_p8  ;;  %s218_s8 = sshll.u32 %s1728_s7, 4  ;;  %s219_s8 = int_to_ptr.vmem [resolvable:$true] %s218_s8 }
  0x16   : > { %2309 = sst [smem:[#allocation19_spill]] %s2308_s27  ;;  %p1332_p11 = scmp.ge.s32.totalorder %s1726_s23, 2 }
  0x17   : > { %p1830_p10 = pnand %p1382_p9, %p124_p1  ;;  %s2293_s10 = smov 512  }
  0x18   : > { %s216_s30 = sshll.u32 %s2310_s1, 4  ;;  %s2294_s11 = smov 32   ;;  %s217_s30 = int_to_ptr.hbm [resolvable:$true] %s216_s30 }
  0x19   : > { %1388 = dma.hbm_to_vmem [thread:$0]  (!%p1830_p10), %s217_s30, 1024, %s219_s8, [#allocation6], %s2293_s10, %s2293_s10, %s2294_s11  }
  0x1a   : > { %s32_s12 = sadd.s32 1, %s1722_s22  ;;  %s110_s13 = sadd.s32 1, %s1714_s20 }
  0x1b   : > { %p33_p12 = scmp.ge.s32.totalorder %s32_s12, 2  ;;  %p117_p13 = scmp.ne.s32.totalorder %s1714_s20, %s1710_s19 }
  0x1c   : > { %p118_p0 = scmp.eq.s32.totalorder %s1726_s23, 0  ;;  %p1406_p7 = scmp.lt.s32.totalorder %s1726_s23, 2 }
  0x1d   : > { %s2333_s12 = smov (%p33_p12, %s32_s12), 0  ;;  %p1853_p5 = por %p175_p2, %p117_p13 }
  0x1e   : > { %2313 = sst [smem:[#allocation20_spill]] %s2333_s12  ;;  %p1847_p3 = por %p118_p0, %p117_p13 }
  0x1f   : > { %s107_s16 = ssub.s32 %s1722_s22, %s2333_s12  ;;  %s244_s17 = sand.u32 1, %s1726_s23  }
  0x20   : > { %p108_p9 = scmp.eq.s32.totalorder %s107_s16, 0  ;;  %s246_s25 = sand.u32 1, %s1714_s20  }
  0x21   : > { %s1333_s29 = sshll.u32 %s246_s25, 11  ;;  %s1362_s30 = sshll.u32 %s1722_s22, 5 }
  0x22   : > { %s1863_s28 = scalar_select %p108_p9, %s1714_s20, %s110_s13  }
  0x23   : > { %s2317_s3 = sld [smem:[#allocation24_spill]]  ;;  %s248_s1 = scalar_lea.vmem [#allocation8], %s1333_s29 }
  0x24   : > { %2316 = sst [smem:[#allocation21_spill]] %s1863_s28  ;;  %s256_s27 = sshll.u32 %s248_s1, 4  ;;  %s257_s27 = int_to_ptr.vmem [resolvable:$true] %s256_s27 }
  0x25   : > { %p1873_p2 = pnand %p1406_p7, %p1847_p3  ;;  %s2319_s0 = sld [smem:[#allocation22_spill]] }
  0x26   : > { %s245_s20 = scalar_lea.sflag [#allocation9], %s244_s17  ;;  %s2321_s29 = smov 512  }
  0x27   : > { %s1732_s1 = smov [#allocation2]   ;;  %s1733_s7 = smov 128  }
  0x28   : > { %s204_s14 = sshll.u32 %s1732_s1, 4  ;;  %s1734_s8 = smov 8   ;;  %s205_s14 = int_to_ptr.vmem [resolvable:$true] %s204_s14 }
  0x29   : > { %s253_s10 = scalar_lea.hbm %s2317_s3, %s1362_s30  ;;  %s1731_s30 = smov 1024  }
  0x2a   : > { %s254_s11 = sshll.u32 %s253_s10, 4  ;;  %s2320_s10 = smov 32   ;;  %s255_s11 = int_to_ptr.hbm [resolvable:$true] %s254_s11 }
  0x2b   : > { %s202_s28 = sshll.u32 %s2319_s0, 4  ;;  %s231_s17 = sshll.u32 %s2289_s2, 4  ;;  %s203_s28 = int_to_ptr.hbm [resolvable:$true] %s202_s28  ;;  %s232_s17 = int_to_ptr.hbm [resolvable:$true] %s231_s17 }
  0x2c   : > { %1395 = dma.hbm_to_vmem [thread:$0]  (!%p1873_p2), %s255_s11, 32768, %s257_s27, %s245_s20, %s1731_s30, %s2321_s29, %s2320_s10  }
  0x2d   : > { %1385 = dma.hbm_to_vmem [thread:$0]  (!%p1830_p10), %s203_s28, 256, %s205_s14, [#allocation3], %s1733_s7, %s1733_s7, %s1734_s8  }
  0x2e   : > { %s1735_s0 = smov [#allocation7]   ;;  %s1336_s23 = sshll.u32 %s246_s25, 2 }
  0x2f   : > { %s233_s3 = sshll.u32 %s1735_s0, 4  ;;  %s1337_s27 = sshll.u32 %s1722_s22, 2  ;;  %s234_s3 = int_to_ptr.vmem [resolvable:$true] %s233_s3 }
  0x30   : > { %1391 = dma.hbm_to_vmem [thread:$0]  (!%p1830_p10), %s232_s17, 64, %s234_s3, [#allocation6]  }
  0x31   : > { %s274_s10 = scalar_lea.hbm %s2291_s4, %s1337_s27  ;;  %s270_s29 = scalar_lea.vmem [#allocation10], %s1336_s23 }
  0x32   : > { %s278_s1 = sshll.u32 %s270_s29, 4  ;;  %s276_s18 = sshll.u32 %s274_s10, 4  ;;  %s279_s1 = int_to_ptr.vmem [resolvable:$true] %s278_s1  ;;  %s277_s18 = int_to_ptr.hbm [resolvable:$true] %s276_s18 }
  0x33   : > { %1398 = dma.hbm_to_vmem [thread:$0]  (!%p1873_p2), %s277_s18, 64, %s279_s1, %s245_s20  }
  0x34   : > { %287 = sbr.rel (%p1822_p8) target bundleno = 443 (0x1bb), region = 40 }
  0x39   : > { %1689 = dma.done.wait (%p124_p1), [#allocation3], 256  }
  0x3a   : > { %1691 = vsyncadd (%p124_p1), [#allocation3], 4294967040 }
  0x3b   : > { %1693 = dma.done.wait (%p124_p1), [#allocation6], 1088  }
  0x3c   : > { %1695 = vsyncadd (%p124_p1), [#allocation6], 4294966208  ;;  %s304_s0 = sand.u32 1, %s1800_s24   ;;  %s1909_s3 = sand.u32 1, %s1710_s19  }
  0x3d   : > { %s1342_s18 = sshll.u32 %s1909_s3, 11  ;;  %s305_s20 = scalar_lea.sflag [#allocation9], %s304_s0 }
  0x3e   : > { %s1912_s23 = scalar_lea.vmem [#allocation8], %s1342_s18 }
  0x3f   : > { %1697 = dma.done.wait (%p1809_p4), %s305_s20, 32832  }
  0x40   : > { %1699 = vsyncadd (%p1809_p4), %s305_s20, 4294934464  ;;  %vm383_vm0 = vcmask 1043456   ;;  %v362_v0 = vld [vmem:[#allocation5 + $0x20] sm:$0xf]  ;;  %v363_v1 = vld [vmem:[#allocation5 + $0x28] sm:$0xf] }
  0x41   : > { %v364_v2 = vld [vmem:[#allocation5 + $0x30] sm:$0xf]  ;;  %1345 = vmatpush.msk.msra.mxu0 %vm383_vm0, %v362_v0  ;;  %1348 = vmatpush.msk.msra.mxu1 %vm383_vm0, %v363_v1  ;;  %v365_v3 = vld [vmem:[#allocation5 + $0x38] sm:$0xf]  ;;  %v358_v4 = vld [vmem:[#allocation5] sm:$0xff]  ;;  %vm376_vm1 = vcmask 97280  }
  0x42   : > { %v359_v5 = vld [vmem:[#allocation5 + $0x8] sm:$0xff]  ;;  %1351 = vmatpush.msk.msra.mxu2 %vm383_vm0, %v364_v2  ;;  %1354 = vmatpush.msk.msra.mxu3 %vm383_vm0, %v365_v3  ;;  %v360_v6 = vld [vmem:[#allocation5 + $0x10] sm:$0xff]  ;;  %v361_v7 = vld [vmem:[#allocation5 + $0x18] sm:$0xff]  ;;  %s1343_s24 = sshll.u32 %s1909_s3, 2  ;;  %s1344_s6 = sshll.u32 %s1909_s3, 6 }
  0x43   : > { %v356_v8 = vld [vmem:[#allocation2] sm:$0xff]  ;;  %411 = vmatpush.msra.mxu0 %v358_v4  ;;  %434 = vmatpush.msra.mxu1 %v359_v5  ;;  %v556_v9 = vld [vmem:[%s1912_s23 + $0x1e0] sm:$0xff]  ;;  %v357_v21 = vld [vmem:[#allocation2 + $0x8] sm:$0xff]  ;;  %s318_s26 = scalar_lea.vmem [#allocation10], %s1343_s24  ;;  %s2236_s9 = scalar_lea.vmem [#allocation11], %s1344_s6 }
  0x44   : > { %457 = vmatpush.msra.mxu2 %v360_v6  ;;  %480 = vmatpush.msra.mxu3 %v361_v7  ;;  %v620_v10 = vld [vmem:[%s1912_s23 + $0x3e0] sm:$0xff]  ;;  %s1363_s25 = sshll.u32 %s1718_s21, 5  ;;  %s1186_s7 = sshll.u32 %s2236_s9, 4  ;;  %s1187_s7 = int_to_ptr.vmem [resolvable:$true] %s1186_s7 }
  0x45   : > { %1346 = vmatmul.msk.f32.vlgmr.msra.gmra.mxu0 %vm376_vm1, %v356_v8  ;;  %1349 = vmatmul.msk.f32.vlgmr.msra.gmra.mxu1 %vm376_vm1, %v356_v8  ;;  %v552_v11 = vld [vmem:[%s1912_s23 + $0x1c0] sm:$0xff]  ;;  %s1185_s14 = scalar_lea.hbm %s2292_s5, %s1363_s25  ;;  %s1171_s12 = scalar_lea.sflag [#allocation4], %s1909_s3 }
  0x46   : > { %1352 = vmatmul.msk.f32.vlgmr.msra.gmra.mxu2 %vm376_vm1, %v356_v8  ;;  %1355 = vmatmul.msk.f32.vlgmr.msra.gmra.mxu3 %vm376_vm1, %v356_v8  ;;  %v616_v12 = vld [vmem:[%s1912_s23 + $0x3c0] sm:$0xff]  ;;  %v557_v8 = vld [vmem:[%s1912_s23 + $0x1e8] sm:$0xff]  ;;  %s1188_s8 = sshll.u32 %s1185_s14, 4  ;;  %s1656_s11 = scalar_lea.hbm %s2292_s5, 128  ;;  %s1189_s8 = int_to_ptr.hbm [resolvable:$true] %s1188_s8 }
  0x47   : > { %v684_v13 = vld [vmem:[%s1912_s23 + $0x5e0] sm:$0xff]  ;;  %762 = vmatpush.msrb.mxu0 %v556_v9  ;;  %785 = vmatpush.msrb.mxu1 %v620_v10  ;;  %v621_v9 = vld [vmem:[%s1912_s23 + $0x3e8] sm:$0xff]  ;;  %s1650_s13 = sshra.s32 %s1189_s8, 4  ;;  %s1651_s13 = int_to_ptr.hbm [resolvable:$true] %s1650_s13 }
  0x48   : > { %v748_v14 = vld [vmem:[%s1912_s23 + $0x7e0] sm:$0xff]  ;;  %808 = vmatpush.msrb.mxu2 %v684_v13  ;;  %v617_v13 = vld [vmem:[%s1912_s23 + $0x3c8] sm:$0xff]  ;;  %s1652_s21 = scalar_lea.hbm %s1651_s13, 64  ;;  %p1657_p10 = scmp.lt.s32.totalorder %s1651_s13, %s2292_s5 }
  0x49   : > { %v680_v15 = vld [vmem:[%s1912_s23 + $0x5c0] sm:$0xff]  ;;  %831 = vmatpush.msrb.mxu3 %v748_v14  ;;  %763 = vmatpush.msrb.mxu0 %v552_v11  ;;  %v685_v14 = vld [vmem:[%s1912_s23 + $0x5e8] sm:$0xff]  ;;  %p1653_p1 = scmp.ne.s32.totalorder %s1651_s13, %s1652_s21  ;;  %p1658_p12 = scmp.lt.s32.totalorder %s1656_s11, %s1652_s21 }
  0x4a   : > { %v744_v16 = vld [vmem:[%s1912_s23 + $0x7c0] sm:$0xff]  ;;  %786 = vmatpush.msrb.mxu1 %v616_v12  ;;  %809 = vmatpush.msrb.mxu2 %v680_v15  ;;  %v553_v12 = vld [vmem:[%s1912_s23 + $0x1c8] sm:$0xff] }
  0x4b   : > { %v548_v17 = vld [vmem:[%s1912_s23 + $0x1a0] sm:$0xff]  ;;  %832 = vmatpush.msrb.mxu3 %v744_v16  ;;  %v749_v15 = vld [vmem:[%s1912_s23 + $0x7e8] sm:$0xff]  ;;  %p1654_p4 = pnand %p1653_p1, %p1853_p5  ;;  %p1659_p13 = por %p1658_p12, %p1657_p10 }
  0x4c   : > { %v612_v18 = vld [vmem:[%s1912_s23 + $0x3a0] sm:$0xff]  ;;  %764 = vmatpush.msrb.mxu0 %v548_v17  ;;  %v549_v16 = vld [vmem:[%s1912_s23 + $0x1a8] sm:$0xff] }
  0x4d   : > { %v676_v19 = vld [vmem:[%s1912_s23 + $0x5a0] sm:$0xff]  ;;  %787 = vmatpush.msrb.mxu1 %v612_v18  ;;  %1347 = vmatmul.msk.f32.gmra.mxu0 %vm376_vm1, %v357_v21  ;;  %v613_v17 = vld [vmem:[%s1912_s23 + $0x3a8] sm:$0xff]  ;;  %p1655_p8 = pneg %p1654_p4 }
  0x4e   : > { %v740_v20 = vld [vmem:[%s1912_s23 + $0x7a0] sm:$0xff]  ;;  %810 = vmatpush.msrb.mxu2 %v676_v19  ;;  %1350 = vmatmul.msk.f32.gmra.mxu1 %vm376_vm1, %v357_v21  ;;  %v681_v18 = vld [vmem:[%s1912_s23 + $0x5c8] sm:$0xff] }
  0x4f   : > { %v544_v22 = vld [vmem:[%s1912_s23 + $0x180] sm:$0xff]  ;;  %833 = vmatpush.msrb.mxu3 %v740_v20  ;;  %1353 = vmatmul.msk.f32.gmra.mxu2 %vm376_vm1, %v357_v21  ;;  %v745_v19 = vld [vmem:[%s1912_s23 + $0x7c8] sm:$0xff]  ;;  %p1660_p0 = pnand %p1659_p13, %p1655_p8 }
  0x50   : > { %v608_v23 = vld [vmem:[%s1912_s23 + $0x380] sm:$0xff]  ;;  %1356 = vmatmul.msk.f32.gmra.mxu3 %vm376_vm1, %v357_v21  ;;  %765 = vmatpush.msrb.mxu0 %v544_v22  ;;  %v545_v20 = vld [vmem:[%s1912_s23 + $0x188] sm:$0xff] }
  0x51   : > { %v672_v24 = vld [vmem:[%s1912_s23 + $0x580] sm:$0xff]  ;;  %788 = vmatpush.msrb.mxu1 %v608_v23  ;;  %v609_v21 = vld [vmem:[%s1912_s23 + $0x388] sm:$0xff] }
  0x52   : > { %v736_v25 = vld [vmem:[%s1912_s23 + $0x780] sm:$0xff]  ;;  %811 = vmatpush.msrb.mxu2 %v672_v24  ;;  %v677_v22 = vld [vmem:[%s1912_s23 + $0x5a8] sm:$0xff] }
  0x53   : > { %v540_v26 = vld [vmem:[%s1912_s23 + $0x160] sm:$0xff]  ;;  %834 = vmatpush.msrb.mxu3 %v736_v25  ;;  %v741_v23 = vld [vmem:[%s1912_s23 + $0x7a8] sm:$0xff] }
  0x54   : > { %v604_v27 = vld [vmem:[%s1912_s23 + $0x360] sm:$0xff]  ;;  %766 = vmatpush.msrb.mxu0 %v540_v26  ;;  %v541_v24 = vld [vmem:[%s1912_s23 + $0x168] sm:$0xff] }
  0x55   : > { %v668_v28 = vld [vmem:[%s1912_s23 + $0x560] sm:$0xff]  ;;  %789 = vmatpush.msrb.mxu1 %v604_v27  ;;  %v605_v25 = vld [vmem:[%s1912_s23 + $0x368] sm:$0xff] }
  0x56   : > { %v732_v29 = vld [vmem:[%s1912_s23 + $0x760] sm:$0xff]  ;;  %812 = vmatpush.msrb.mxu2 %v668_v28  ;;  %v673_v26 = vld [vmem:[%s1912_s23 + $0x588] sm:$0xff] }
  0x57   : > { %v536_v30 = vld [vmem:[%s1912_s23 + $0x140] sm:$0xff]  ;;  %835 = vmatpush.msrb.mxu3 %v732_v29  ;;  %v737_v27 = vld [vmem:[%s1912_s23 + $0x788] sm:$0xff] }
  0x58   : > { %v600_v31 = vld [vmem:[%s1912_s23 + $0x340] sm:$0xff]  ;;  %767 = vmatpush.msrb.mxu0 %v536_v30  ;;  %v537_v28 = vld [vmem:[%s1912_s23 + $0x148] sm:$0xff] }
  0x59   : > { %v664_v32 = vld [vmem:[%s1912_s23 + $0x540] sm:$0xff]  ;;  %790 = vmatpush.msrb.mxu1 %v600_v31  ;;  %v601_v29 = vld [vmem:[%s1912_s23 + $0x348] sm:$0xff] }
  0x5a   : > { %v728_v33 = vld [vmem:[%s1912_s23 + $0x740] sm:$0xff]  ;;  %813 = vmatpush.msrb.mxu2 %v664_v32  ;;  %v669_v30 = vld [vmem:[%s1912_s23 + $0x568] sm:$0xff] }
  0x5b   : > { %v532_v34 = vld [vmem:[%s1912_s23 + $0x120] sm:$0xff]  ;;  %836 = vmatpush.msrb.mxu3 %v728_v33  ;;  %v733_v31 = vld [vmem:[%s1912_s23 + $0x768] sm:$0xff] }
  0x5c   : > { %v596_v35 = vld [vmem:[%s1912_s23 + $0x320] sm:$0xff]  ;;  %768 = vmatpush.msrb.mxu0 %v532_v34  ;;  %v533_v32 = vld [vmem:[%s1912_s23 + $0x128] sm:$0xff] }
  0x5d   : > { %v660_v36 = vld [vmem:[%s1912_s23 + $0x520] sm:$0xff]  ;;  %791 = vmatpush.msrb.mxu1 %v596_v35  ;;  %v597_v33 = vld [vmem:[%s1912_s23 + $0x328] sm:$0xff] }
  0x5e   : > { %v724_v37 = vld [vmem:[%s1912_s23 + $0x720] sm:$0xff]  ;;  %814 = vmatpush.msrb.mxu2 %v660_v36  ;;  %v665_v34 = vld [vmem:[%s1912_s23 + $0x548] sm:$0xff] }
  0x5f   : > { %v528_v38 = vld [vmem:[%s1912_s23 + $0x100] sm:$0xff]  ;;  %837 = vmatpush.msrb.mxu3 %v724_v37  ;;  %v729_v35 = vld [vmem:[%s1912_s23 + $0x748] sm:$0xff] }
  0x60   : > { %v592_v39 = vld [vmem:[%s1912_s23 + $0x300] sm:$0xff]  ;;  %769 = vmatpush.msrb.mxu0 %v528_v38  ;;  %v529_v36 = vld [vmem:[%s1912_s23 + $0x108] sm:$0xff] }
  0x61   : > { %v656_v40 = vld [vmem:[%s1912_s23 + $0x500] sm:$0xff]  ;;  %792 = vmatpush.msrb.mxu1 %v592_v39  ;;  %v593_v37 = vld [vmem:[%s1912_s23 + $0x308] sm:$0xff] }
  0x62   : > { %v720_v41 = vld [vmem:[%s1912_s23 + $0x700] sm:$0xff]  ;;  %815 = vmatpush.msrb.mxu2 %v656_v40  ;;  %v661_v38 = vld [vmem:[%s1912_s23 + $0x528] sm:$0xff] }
  0x63   : > { %v524_v42 = vld [vmem:[%s1912_s23 + $0xe0] sm:$0xff]  ;;  %838 = vmatpush.msrb.mxu3 %v720_v41  ;;  %v725_v39 = vld [vmem:[%s1912_s23 + $0x728] sm:$0xff] }
  0x64   : > { %v588_v43 = vld [vmem:[%s1912_s23 + $0x2e0] sm:$0xff]  ;;  %770 = vmatpush.msrb.mxu0 %v524_v42  ;;  %v525_v40 = vld [vmem:[%s1912_s23 + $0xe8] sm:$0xff] }
  0x65   : > { %v652_v44 = vld [vmem:[%s1912_s23 + $0x4e0] sm:$0xff]  ;;  %793 = vmatpush.msrb.mxu1 %v588_v43  ;;  %v589_v41 = vld [vmem:[%s1912_s23 + $0x2e8] sm:$0xff] }
  0x66   : > { %v716_v45 = vld [vmem:[%s1912_s23 + $0x6e0] sm:$0xff]  ;;  %816 = vmatpush.msrb.mxu2 %v652_v44  ;;  %v657_v42 = vld [vmem:[%s1912_s23 + $0x508] sm:$0xff] }
  0x67   : > { %v520_v46 = vld [vmem:[%s1912_s23 + $0xc0] sm:$0xff]  ;;  %839 = vmatpush.msrb.mxu3 %v716_v45  ;;  %v721_v43 = vld [vmem:[%s1912_s23 + $0x708] sm:$0xff] }
  0x68   : > { %v584_v47 = vld [vmem:[%s1912_s23 + $0x2c0] sm:$0xff]  ;;  %771 = vmatpush.msrb.mxu0 %v520_v46  ;;  %v521_v44 = vld [vmem:[%s1912_s23 + $0xc8] sm:$0xff] }
  0x69   : > { %v648_v48 = vld [vmem:[%s1912_s23 + $0x4c0] sm:$0xff]  ;;  %794 = vmatpush.msrb.mxu1 %v584_v47  ;;  %v585_v45 = vld [vmem:[%s1912_s23 + $0x2c8] sm:$0xff] }
  0x6a   : > { %v712_v49 = vld [vmem:[%s1912_s23 + $0x6c0] sm:$0xff]  ;;  %817 = vmatpush.msrb.mxu2 %v648_v48  ;;  %v653_v46 = vld [vmem:[%s1912_s23 + $0x4e8] sm:$0xff] }
  0x6b   : > { %v516_v50 = vld [vmem:[%s1912_s23 + $0xa0] sm:$0xff]  ;;  %840 = vmatpush.msrb.mxu3 %v712_v49  ;;  %v717_v47 = vld [vmem:[%s1912_s23 + $0x6e8] sm:$0xff] }
  0x6c   : > { %v580_v51 = vld [vmem:[%s1912_s23 + $0x2a0] sm:$0xff]  ;;  %772 = vmatpush.msrb.mxu0 %v516_v50  ;;  %v517_v48 = vld [vmem:[%s1912_s23 + $0xa8] sm:$0xff] }
  0x6d   : > { %v644_v52 = vld [vmem:[%s1912_s23 + $0x4a0] sm:$0xff]  ;;  %795 = vmatpush.msrb.mxu1 %v580_v51  ;;  %v581_v49 = vld [vmem:[%s1912_s23 + $0x2a8] sm:$0xff] }
  0x6e   : > { %v708_v53 = vld [vmem:[%s1912_s23 + $0x6a0] sm:$0xff]  ;;  %818 = vmatpush.msrb.mxu2 %v644_v52  ;;  %v649_v50 = vld [vmem:[%s1912_s23 + $0x4c8] sm:$0xff] }
  0x6f   : > { %v512_v54 = vld [vmem:[%s1912_s23 + $0x80] sm:$0xff]  ;;  %841 = vmatpush.msrb.mxu3 %v708_v53  ;;  %v713_v51 = vld [vmem:[%s1912_s23 + $0x6c8] sm:$0xff] }
  0x70   : > { %v576_v55 = vld [vmem:[%s1912_s23 + $0x280] sm:$0xff]  ;;  %773 = vmatpush.msrb.mxu0 %v512_v54  ;;  %v513_v52 = vld [vmem:[%s1912_s23 + $0x88] sm:$0xff] }
  0x71   : > { %v640_v56 = vld [vmem:[%s1912_s23 + $0x480] sm:$0xff]  ;;  %796 = vmatpush.msrb.mxu1 %v576_v55  ;;  %v577_v53 = vld [vmem:[%s1912_s23 + $0x288] sm:$0xff] }
  0x72   : > { %v704_v57 = vld [vmem:[%s1912_s23 + $0x680] sm:$0xff]  ;;  %819 = vmatpush.msrb.mxu2 %v640_v56  ;;  %v509_v54 = vld [vmem:[%s1912_s23 + $0x68] sm:$0xff] }
  0x73   : > { %v508_v58 = vld [vmem:[%s1912_s23 + $0x60] sm:$0xff]  ;;  %842 = vmatpush.msrb.mxu3 %v704_v57  ;;  %v573_v55 = vld [vmem:[%s1912_s23 + $0x268] sm:$0xff] }
  0x74   : > { %v572_v59 = vld [vmem:[%s1912_s23 + $0x260] sm:$0xff]  ;;  %774 = vmatpush.msrb.mxu0 %v508_v58  ;;  %v505_v56 = vld [vmem:[%s1912_s23 + $0x48] sm:$0xff] }
  0x75   : > { %v636_v60 = vld [vmem:[%s1912_s23 + $0x460] sm:$0xff]  ;;  %797 = vmatpush.msrb.mxu1 %v572_v59  ;;  %v569_v57 = vld [vmem:[%s1912_s23 + $0x248] sm:$0xff] }
  0x76   : > { %v700_v61 = vld [vmem:[%s1912_s23 + $0x660] sm:$0xff]  ;;  %820 = vmatpush.msrb.mxu2 %v636_v60  ;;  %v645_v58 = vld [vmem:[%s1912_s23 + $0x4a8] sm:$0xff] }
  0x77   : > { %v504_v62 = vld [vmem:[%s1912_s23 + $0x40] sm:$0xff]  ;;  %843 = vmatpush.msrb.mxu3 %v700_v61  ;;  %v709_v59 = vld [vmem:[%s1912_s23 + $0x6a8] sm:$0xff] }
  0x78   : > { %v568_v63 = vld [vmem:[%s1912_s23 + $0x240] sm:$0xff]  ;;  %775 = vmatpush.msrb.mxu0 %v504_v62  ;;  %v501_v60 = vld [vmem:[%s1912_s23 + $0x28] sm:$0xff] }
  0x79   : > { %v632_v0 = vld [vmem:[%s1912_s23 + $0x440] sm:$0xff]  ;;  %798 = vmatpush.msrb.mxu1 %v568_v63  ;;  %v565_v61 = vld [vmem:[%s1912_s23 + $0x228] sm:$0xff] }
  0x7a   : > { %v696_v1 = vld [vmem:[%s1912_s23 + $0x640] sm:$0xff]  ;;  %821 = vmatpush.msrb.mxu2 %v632_v0  ;;  %v641_v62 = vld [vmem:[%s1912_s23 + $0x488] sm:$0xff] }
  0x7b   : > { %v500_v2 = vld [vmem:[%s1912_s23 + $0x20] sm:$0xff]  ;;  %844 = vmatpush.msrb.mxu3 %v696_v1  ;;  %v705_v63 = vld [vmem:[%s1912_s23 + $0x688] sm:$0xff] }
  0x7c   : > { %v564_v3 = vld [vmem:[%s1912_s23 + $0x220] sm:$0xff]  ;;  %776 = vmatpush.msrb.mxu0 %v500_v2  ;;  %v497_v0 = vld [vmem:[%s1912_s23 + $0x8] sm:$0xff] }
  0x7d   : > { %v628_v4 = vld [vmem:[%s1912_s23 + $0x420] sm:$0xff]  ;;  %799 = vmatpush.msrb.mxu1 %v564_v3  ;;  %v561_v1 = vld [vmem:[%s1912_s23 + $0x208] sm:$0xff] }
  0x7e   : > { %v692_v5 = vld [vmem:[%s1912_s23 + $0x620] sm:$0xff]  ;;  %822 = vmatpush.msrb.mxu2 %v628_v4  ;;  %v637_v2 = vld [vmem:[%s1912_s23 + $0x468] sm:$0xff] }
  0x7f   : > { %v496_v6 = vld [vmem:[%s1912_s23] sm:$0xff]  ;;  %845 = vmatpush.msrb.mxu3 %v692_v5  ;;  %v701_v3 = vld [vmem:[%s1912_s23 + $0x668] sm:$0xff] }
  0x80   : > { %v560_v7 = vld [vmem:[%s1912_s23 + $0x200] sm:$0xff]  ;;  %777 = vmatpush.msrb.mxu0 %v496_v6  ;;  %v633_v4 = vld [vmem:[%s1912_s23 + $0x448] sm:$0xff] }
  0x81   : > { %v624_v10 = vld [vmem:[%s1912_s23 + $0x400] sm:$0xff]  ;;  %800 = vmatpush.msrb.mxu1 %v560_v7  ;;  %v697_v5 = vld [vmem:[%s1912_s23 + $0x648] sm:$0xff] }
  0x82   : > { %v688_v11 = vld [vmem:[%s1912_s23 + $0x600] sm:$0xff]  ;;  %854 = vmatpush.msra.mxu0 %v557_v8  ;;  %823 = vmatpush.msrb.mxu2 %v624_v10  ;;  %v629_v6 = vld [vmem:[%s1912_s23 + $0x428] sm:$0xff]  ;;  %v366_v10 = vld [vmem:[#allocation7] sm:$0xf] }
  0x83   : > { %877 = vmatpush.msra.mxu1 %v621_v9  ;;  %846 = vmatpush.msrb.mxu3 %v688_v11  ;;  %v693_v7 = vld [vmem:[%s1912_s23 + $0x628] sm:$0xff]  ;;  %v368_v11 = vperm.slane %v366_v10, 0 }
  0x84   : > { %855 = vmatpush.msra.mxu0 %v553_v12  ;;  %900 = vmatpush.msra.mxu2 %v685_v14  ;;  %v625_v8 = vld [vmem:[%s1912_s23 + $0x408] sm:$0xff]  ;;  %v369_v12 = vperm.slane %v366_v10, 1 }
  0x85   : > { %878 = vmatpush.msra.mxu1 %v617_v13  ;;  %923 = vmatpush.msra.mxu3 %v749_v15  ;;  %v689_v9 = vld [vmem:[%s1912_s23 + $0x608] sm:$0xff] }
  0x86   : > { %856 = vmatpush.msra.mxu0 %v549_v16  ;;  %901 = vmatpush.msra.mxu2 %v681_v18 }
  0x87   : > { %879 = vmatpush.msra.mxu1 %v613_v17  ;;  %924 = vmatpush.msra.mxu3 %v745_v19  ;;  %v558_v19 = vld [vmem:[%s1912_s23 + $0x1f0] sm:$0xff] }
  0x88   : > { %857 = vmatpush.msra.mxu0 %v545_v20  ;;  %902 = vmatpush.msra.mxu2 %v677_v22  ;;  %v622_v20 = vld [vmem:[%s1912_s23 + $0x3f0] sm:$0xff]  ;;  %v371_v22 = vperm.slane %v366_v10, 3 }
  0x89   : > { %880 = vmatpush.msra.mxu1 %v609_v21  ;;  %925 = vmatpush.msra.mxu3 %v741_v23  ;;  %v370_v21 = vperm.slane %v366_v10, 2  ;;  %v554_v23 = vld [vmem:[%s1912_s23 + $0x1d0] sm:$0xff] }
  0x8a   : > { %858 = vmatpush.msra.mxu0 %v541_v24  ;;  %903 = vmatpush.msra.mxu2 %v673_v26  ;;  %v618_v24 = vld [vmem:[%s1912_s23 + $0x3d0] sm:$0xff] }
  0x8b   : > { %881 = vmatpush.msra.mxu1 %v605_v25  ;;  %926 = vmatpush.msra.mxu3 %v737_v27  ;;  %v550_v27 = vld [vmem:[%s1912_s23 + $0x1b0] sm:$0xff] }
  0x8c   : > { %859 = vmatpush.msra.mxu0 %v537_v28  ;;  %904 = vmatpush.msra.mxu2 %v669_v30  ;;  %v614_v28 = vld [vmem:[%s1912_s23 + $0x3b0] sm:$0xff] }
  0x8d   : > { %882 = vmatpush.msra.mxu1 %v601_v29  ;;  %927 = vmatpush.msra.mxu3 %v733_v31  ;;  %v582_v10 = vld [vmem:[%s1912_s23 + $0x2b0] sm:$0xff] }
  0x8e   : > { %860 = vmatpush.msra.mxu0 %v533_v32  ;;  %905 = vmatpush.msra.mxu2 %v665_v34 }
  0x8f   : > { %883 = vmatpush.msra.mxu1 %v597_v33  ;;  %928 = vmatpush.msra.mxu3 %v729_v35 }
  0x90   : > { %861 = vmatpush.msra.mxu0 %v529_v36  ;;  %906 = vmatpush.msra.mxu2 %v661_v38  ;;  %v610_v38 = vld [vmem:[%s1912_s23 + $0x390] sm:$0xff] }
  0x91   : > { %884 = vmatpush.msra.mxu1 %v593_v37  ;;  %929 = vmatpush.msra.mxu3 %v725_v39  ;;  %v546_v37 = vld [vmem:[%s1912_s23 + $0x190] sm:$0xff] }
  0x92   : > { %862 = vmatpush.msra.mxu0 %v525_v40  ;;  %907 = vmatpush.msra.mxu2 %v657_v42  ;;  %v750_v42 = vld [vmem:[%s1912_s23 + $0x7f0] sm:$0xff] }
  0x93   : > { %885 = vmatpush.msra.mxu1 %v589_v41  ;;  %930 = vmatpush.msra.mxu3 %v721_v43  ;;  %v686_v41 = vld [vmem:[%s1912_s23 + $0x5f0] sm:$0xff] }
  0x94   : > { %863 = vmatpush.msra.mxu0 %v521_v44  ;;  %908 = vmatpush.msra.mxu2 %v653_v46  ;;  %v542_v43 = vld [vmem:[%s1912_s23 + $0x170] sm:$0xff] }
  0x95   : > { %886 = vmatpush.msra.mxu1 %v585_v45  ;;  %931 = vmatpush.msra.mxu3 %v717_v47  ;;  %v606_v44 = vld [vmem:[%s1912_s23 + $0x370] sm:$0xff] }
  0x96   : > { %864 = vmatpush.msra.mxu0 %v517_v48  ;;  %909 = vmatpush.msra.mxu2 %v649_v50  ;;  %v682_v45 = vld [vmem:[%s1912_s23 + $0x5d0] sm:$0xff] }
  0x97   : > { %887 = vmatpush.msra.mxu1 %v581_v49  ;;  %932 = vmatpush.msra.mxu3 %v713_v51  ;;  %v746_v46 = vld [vmem:[%s1912_s23 + $0x7d0] sm:$0xff] }
  0x98   : > { %865 = vmatpush.msra.mxu0 %v513_v52  ;;  %910 = vmatpush.msra.mxu2 %v645_v58  ;;  %v538_v49 = vld [vmem:[%s1912_s23 + $0x150] sm:$0xff] }
  0x99   : > { %888 = vmatpush.msra.mxu1 %v577_v53  ;;  %933 = vmatpush.msra.mxu3 %v709_v59  ;;  %v602_v50 = vld [vmem:[%s1912_s23 + $0x350] sm:$0xff] }
  0x9a   : > { %866 = vmatpush.msra.mxu0 %v509_v54  ;;  %911 = vmatpush.msra.mxu2 %v641_v62  ;;  %v678_v53 = vld [vmem:[%s1912_s23 + $0x5b0] sm:$0xff] }
  0x9b   : > { %889 = vmatpush.msra.mxu1 %v573_v55  ;;  %934 = vmatpush.msra.mxu3 %v705_v63  ;;  %v742_v54 = vld [vmem:[%s1912_s23 + $0x7b0] sm:$0xff] }
  0x9c   : > { %867 = vmatpush.msra.mxu0 %v505_v56  ;;  %912 = vmatpush.msra.mxu2 %v637_v2  ;;  %v534_v55 = vld [vmem:[%s1912_s23 + $0x130] sm:$0xff] }
  0x9d   : > { %890 = vmatpush.msra.mxu1 %v569_v57  ;;  %935 = vmatpush.msra.mxu3 %v701_v3  ;;  %v598_v56 = vld [vmem:[%s1912_s23 + $0x330] sm:$0xff] }
  0x9e   : > { %868 = vmatpush.msra.mxu0 %v501_v60  ;;  %913 = vmatpush.msra.mxu2 %v633_v4  ;;  %v674_v59 = vld [vmem:[%s1912_s23 + $0x590] sm:$0xff] }
  0x9f   : > { %891 = vmatpush.msra.mxu1 %v565_v61  ;;  %936 = vmatpush.msra.mxu3 %v697_v5  ;;  %v738_v60 = vld [vmem:[%s1912_s23 + $0x790] sm:$0xff] }
  0xa0   : > { %869 = vmatpush.msra.mxu0 %v497_v0  ;;  %914 = vmatpush.msra.mxu2 %v629_v6  ;;  %v530_v61 = vld [vmem:[%s1912_s23 + $0x110] sm:$0xff] }
  0xa1   : > { %892 = vmatpush.msra.mxu1 %v561_v1  ;;  %937 = vmatpush.msra.mxu3 %v693_v7  ;;  %v594_v62 = vld [vmem:[%s1912_s23 + $0x310] sm:$0xff] }
  0xa2   : > { %915 = vmatpush.msra.mxu2 %v625_v8  ;;  %v670_v63 = vld [vmem:[%s1912_s23 + $0x570] sm:$0xff] }
  0xa3   : > { %938 = vmatpush.msra.mxu3 %v689_v9  ;;  %v734_v0 = vld [vmem:[%s1912_s23 + $0x770] sm:$0xff] }
  0xa4   : > { %v526_v1 = vld [vmem:[%s1912_s23 + $0xf0] sm:$0xff] }
  0xa5   : > { %v590_v2 = vld [vmem:[%s1912_s23 + $0x2f0] sm:$0xff] }
  0xa6   : > { %v666_v3 = vld [vmem:[%s1912_s23 + $0x550] sm:$0xff] }
  0xa7   : > { %v730_v4 = vld [vmem:[%s1912_s23 + $0x750] sm:$0xff] }
  0xa8   : > { %v522_v5 = vld [vmem:[%s1912_s23 + $0xd0] sm:$0xff] }
  0xa9   : > { %v586_v6 = vld [vmem:[%s1912_s23 + $0x2d0] sm:$0xff] }
  0xaa   : > { %v662_v7 = vld [vmem:[%s1912_s23 + $0x530] sm:$0xff] }
  0xab   : > { %v726_v8 = vld [vmem:[%s1912_s23 + $0x730] sm:$0xff] }
  0xac   : > { %v518_v9 = vld [vmem:[%s1912_s23 + $0xb0] sm:$0xff] }
  0xc2   : > { %v413_v13 = vpop.f32.mrf.mxu0  ;;  %v436_v14 = vpop.f32.mrf.mxu1 }
  0xc3   : > { %v414_v15 = vadd.f32 %v413_v13, %v368_v11  ;;  %v437_v16 = vadd.f32 %v436_v14, %v369_v12  ;;  %v514_v13 = vld [vmem:[%s1912_s23 + $0x90] sm:$0xff] }
  0xc4   : > { %v578_v14 = vld [vmem:[%s1912_s23 + $0x290] sm:$0xff] }
  0xc5   : > { %v2054_v17 = vmax.f32 %v414_v15, 0.0  ;;  %v2056_v18 = vmax.f32 %v437_v16, 0.0  ;;  %v654_v15 = vld [vmem:[%s1912_s23 + $0x4f0] sm:$0xff] }
  0xc6   : > { %v718_v16 = vld [vmem:[%s1912_s23 + $0x6f0] sm:$0xff] }
  0xc7   : > { %778 = vmatmul.f32.vlgmr.msrb.gmra.mxu0 %v2054_v17  ;;  %801 = vmatmul.f32.vlgmr.msrb.gmra.mxu1 %v2056_v18 }
  0xc8   : > { %946 = vmatpush.msrb.mxu0 %v558_v19  ;;  %969 = vmatpush.msrb.mxu1 %v622_v20  ;;  %v510_v19 = vld [vmem:[%s1912_s23 + $0x70] sm:$0xff] }
  0xc9   : > { %v459_v25 = vpop.f32.mrf.mxu2  ;;  %v482_v26 = vpop.f32.mrf.mxu3  ;;  %v574_v20 = vld [vmem:[%s1912_s23 + $0x270] sm:$0xff] }
  0xca   : > { %v460_v29 = vadd.f32 %v459_v25, %v370_v21  ;;  %v483_v30 = vadd.f32 %v482_v26, %v371_v22  ;;  %947 = vmatpush.msrb.mxu0 %v554_v23  ;;  %970 = vmatpush.msrb.mxu1 %v618_v24  ;;  %v416_v31 = vpop.f32.mrf.mxu0  ;;  %v506_v23 = vld [vmem:[%s1912_s23 + $0x50] sm:$0xff] }
  0xcb   : > { %v439_v32 = vpop.f32.mrf.mxu1  ;;  %v417_v33 = vadd.f32 %v416_v31, %v368_v11  ;;  %v658_v11 = vld [vmem:[%s1912_s23 + $0x510] sm:$0xff] }
  0xcc   : > { %v440_v34 = vadd.f32 %v439_v32, %v369_v12  ;;  %v2066_v35 = vmax.f32 %v460_v29, 0.0  ;;  %v2068_v36 = vmax.f32 %v483_v30, 0.0  ;;  %948 = vmatpush.msrb.mxu0 %v550_v27  ;;  %971 = vmatpush.msrb.mxu1 %v614_v28  ;;  %v722_v12 = vld [vmem:[%s1912_s23 + $0x710] sm:$0xff] }
  0xcd   : > { %v2072_v39 = vmax.f32 %v417_v33, 0.0  ;;  %v570_v24 = vld [vmem:[%s1912_s23 + $0x250] sm:$0xff] }
  0xce   : > { %v2074_v40 = vmax.f32 %v440_v34, 0.0  ;;  %824 = vmatmul.f32.vlgmr.msrb.gmra.mxu2 %v2066_v35  ;;  %847 = vmatmul.f32.vlgmr.msrb.gmra.mxu3 %v2068_v36  ;;  %v646_v25 = vld [vmem:[%s1912_s23 + $0x4b0] sm:$0xff] }
  0xcf   : > { %949 = vmatpush.msrb.mxu0 %v546_v37  ;;  %972 = vmatpush.msrb.mxu1 %v610_v38  ;;  %v710_v26 = vld [vmem:[%s1912_s23 + $0x6b0] sm:$0xff]  ;;  %v559_v37 = vld [vmem:[%s1912_s23 + $0x1f8] sm:$0xff] }
  0xd0   : > { %992 = vmatpush.msrb.mxu2 %v686_v41  ;;  %1015 = vmatpush.msrb.mxu3 %v750_v42  ;;  %v502_v27 = vld [vmem:[%s1912_s23 + $0x30] sm:$0xff]  ;;  %v623_v38 = vld [vmem:[%s1912_s23 + $0x3f8] sm:$0xff] }
  0xd1   : > { %781 = vmatmul.f32.gmra.mxu0 %v2072_v39  ;;  %804 = vmatmul.f32.gmra.mxu1 %v2074_v40  ;;  %v566_v28 = vld [vmem:[%s1912_s23 + $0x230] sm:$0xff] }
  0xd2   : > { %v462_v47 = vpop.f32.mrf.mxu2  ;;  %950 = vmatpush.msrb.mxu0 %v542_v43  ;;  %973 = vmatpush.msrb.mxu1 %v606_v44  ;;  %v642_v29 = vld [vmem:[%s1912_s23 + $0x490] sm:$0xff]  ;;  %v555_v43 = vld [vmem:[%s1912_s23 + $0x1d8] sm:$0xff] }
  0xd3   : > { %v485_v48 = vpop.f32.mrf.mxu3  ;;  %v463_v51 = vadd.f32 %v462_v47, %v370_v21  ;;  %993 = vmatpush.msrb.mxu2 %v682_v45  ;;  %1016 = vmatpush.msrb.mxu3 %v746_v46  ;;  %v650_v21 = vld [vmem:[%s1912_s23 + $0x4d0] sm:$0xff]  ;;  %v619_v44 = vld [vmem:[%s1912_s23 + $0x3d8] sm:$0xff] }
  0xd4   : > { %v486_v52 = vadd.f32 %v485_v48, %v371_v22  ;;  %951 = vmatpush.msrb.mxu0 %v538_v49  ;;  %974 = vmatpush.msrb.mxu1 %v602_v50  ;;  %v714_v22 = vld [vmem:[%s1912_s23 + $0x6d0] sm:$0xff]  ;;  %v551_v47 = vld [vmem:[%s1912_s23 + $0x1b8] sm:$0xff] }
  0xd5   : > { %v2092_v57 = vmax.f32 %v463_v51, 0.0  ;;  %994 = vmatpush.msrb.mxu2 %v678_v53  ;;  %1017 = vmatpush.msrb.mxu3 %v742_v54  ;;  %v706_v30 = vld [vmem:[%s1912_s23 + $0x690] sm:$0xff]  ;;  %v615_v48 = vld [vmem:[%s1912_s23 + $0x3b8] sm:$0xff] }
  0xd6   : > { %v2094_v58 = vmax.f32 %v486_v52, 0.0  ;;  %952 = vmatpush.msrb.mxu0 %v534_v55  ;;  %975 = vmatpush.msrb.mxu1 %v598_v56  ;;  %v498_v31 = vld [vmem:[%s1912_s23 + $0x10] sm:$0xff]  ;;  %v547_v51 = vld [vmem:[%s1912_s23 + $0x198] sm:$0xff] }
  0xd7   : > { %995 = vmatpush.msrb.mxu2 %v674_v59  ;;  %1018 = vmatpush.msrb.mxu3 %v738_v60  ;;  %v562_v32 = vld [vmem:[%s1912_s23 + $0x210] sm:$0xff]  ;;  %v611_v52 = vld [vmem:[%s1912_s23 + $0x398] sm:$0xff] }
  0xd8   : > { %827 = vmatmul.f32.gmra.mxu2 %v2092_v57  ;;  %850 = vmatmul.f32.gmra.mxu3 %v2094_v58  ;;  %v638_v33 = vld [vmem:[%s1912_s23 + $0x470] sm:$0xff]  ;;  %v687_v53 = vld [vmem:[%s1912_s23 + $0x5f8] sm:$0xff] }
  0xd9   : > { %953 = vmatpush.msrb.mxu0 %v530_v61  ;;  %976 = vmatpush.msrb.mxu1 %v594_v62  ;;  %v702_v34 = vld [vmem:[%s1912_s23 + $0x670] sm:$0xff]  ;;  %v751_v54 = vld [vmem:[%s1912_s23 + $0x7f8] sm:$0xff] }
  0xda   : > { %996 = vmatpush.msrb.mxu2 %v670_v63  ;;  %1019 = vmatpush.msrb.mxu3 %v734_v0  ;;  %v634_v41 = vld [vmem:[%s1912_s23 + $0x450] sm:$0xff]  ;;  %v543_v55 = vld [vmem:[%s1912_s23 + $0x178] sm:$0xff] }
  0xdb   : > { %870 = vmatmul.f32.vlgmr.msra.gmra.mxu0 %v2054_v17  ;;  %893 = vmatmul.f32.vlgmr.msra.gmra.mxu1 %v2056_v18  ;;  %v698_v42 = vld [vmem:[%s1912_s23 + $0x650] sm:$0xff]  ;;  %v607_v56 = vld [vmem:[%s1912_s23 + $0x378] sm:$0xff] }
  0xdc   : > { %954 = vmatpush.msrb.mxu0 %v526_v1  ;;  %977 = vmatpush.msrb.mxu1 %v590_v2  ;;  %v630_v45 = vld [vmem:[%s1912_s23 + $0x430] sm:$0xff]  ;;  %v683_v59 = vld [vmem:[%s1912_s23 + $0x5d8] sm:$0xff] }
  0xdd   : > { %997 = vmatpush.msrb.mxu2 %v666_v3  ;;  %1020 = vmatpush.msrb.mxu3 %v730_v4  ;;  %v694_v46 = vld [vmem:[%s1912_s23 + $0x630] sm:$0xff]  ;;  %v747_v60 = vld [vmem:[%s1912_s23 + $0x7d8] sm:$0xff] }
  0xde   : > { %955 = vmatpush.msrb.mxu0 %v522_v5  ;;  %978 = vmatpush.msrb.mxu1 %v586_v6  ;;  %v626_v49 = vld [vmem:[%s1912_s23 + $0x410] sm:$0xff]  ;;  %v539_v61 = vld [vmem:[%s1912_s23 + $0x158] sm:$0xff] }
  0xdf   : > { %998 = vmatpush.msrb.mxu2 %v662_v7  ;;  %1021 = vmatpush.msrb.mxu3 %v726_v8  ;;  %v690_v50 = vld [vmem:[%s1912_s23 + $0x610] sm:$0xff]  ;;  %v603_v62 = vld [vmem:[%s1912_s23 + $0x358] sm:$0xff] }
  0xe0   : > { %956 = vmatpush.msrb.mxu0 %v518_v9  ;;  %979 = vmatpush.msrb.mxu1 %v582_v10  ;;  %v679_v63 = vld [vmem:[%s1912_s23 + $0x5b8] sm:$0xff] }
  0xe1   : > { %999 = vmatpush.msrb.mxu2 %v658_v11  ;;  %1022 = vmatpush.msrb.mxu3 %v722_v12  ;;  %v743_v0 = vld [vmem:[%s1912_s23 + $0x7b8] sm:$0xff] }
  0xe2   : > { %916 = vmatmul.f32.vlgmr.msra.gmra.mxu2 %v2066_v35  ;;  %939 = vmatmul.f32.vlgmr.msra.gmra.mxu3 %v2068_v36  ;;  %v535_v1 = vld [vmem:[%s1912_s23 + $0x138] sm:$0xff] }
  0xe3   : > { %957 = vmatpush.msrb.mxu0 %v514_v13  ;;  %980 = vmatpush.msrb.mxu1 %v578_v14  ;;  %v599_v2 = vld [vmem:[%s1912_s23 + $0x338] sm:$0xff] }
  0xe4   : > { %1000 = vmatpush.msrb.mxu2 %v654_v15  ;;  %1023 = vmatpush.msrb.mxu3 %v718_v16  ;;  %v675_v3 = vld [vmem:[%s1912_s23 + $0x598] sm:$0xff] }
  0xe5   : > { %873 = vmatmul.f32.gmra.mxu0 %v2072_v39  ;;  %896 = vmatmul.f32.gmra.mxu1 %v2074_v40  ;;  %v739_v4 = vld [vmem:[%s1912_s23 + $0x798] sm:$0xff] }
  0xe6   : > { %958 = vmatpush.msrb.mxu0 %v510_v19  ;;  %981 = vmatpush.msrb.mxu1 %v574_v20  ;;  %v531_v5 = vld [vmem:[%s1912_s23 + $0x118] sm:$0xff] }
  0xe7   : > { %1001 = vmatpush.msrb.mxu2 %v650_v21  ;;  %1024 = vmatpush.msrb.mxu3 %v714_v22  ;;  %v595_v6 = vld [vmem:[%s1912_s23 + $0x318] sm:$0xff] }
  0xe8   : > { %959 = vmatpush.msrb.mxu0 %v506_v23  ;;  %982 = vmatpush.msrb.mxu1 %v570_v24  ;;  %v671_v7 = vld [vmem:[%s1912_s23 + $0x578] sm:$0xff] }
  0xe9   : > { %1002 = vmatpush.msrb.mxu2 %v646_v25  ;;  %1025 = vmatpush.msrb.mxu3 %v710_v26  ;;  %v735_v8 = vld [vmem:[%s1912_s23 + $0x778] sm:$0xff] }
  0xea   : > { %960 = vmatpush.msrb.mxu0 %v502_v27  ;;  %983 = vmatpush.msrb.mxu1 %v566_v28  ;;  %v527_v9 = vld [vmem:[%s1912_s23 + $0xf8] sm:$0xff] }
  0xeb   : > { %1003 = vmatpush.msrb.mxu2 %v642_v29  ;;  %1026 = vmatpush.msrb.mxu3 %v706_v30  ;;  %v591_v10 = vld [vmem:[%s1912_s23 + $0x2f8] sm:$0xff] }
  0xec   : > { %919 = vmatmul.f32.gmra.mxu2 %v2092_v57  ;;  %942 = vmatmul.f32.gmra.mxu3 %v2094_v58  ;;  %v667_v11 = vld [vmem:[%s1912_s23 + $0x558] sm:$0xff] }
  0xed   : > { %961 = vmatpush.msrb.mxu0 %v498_v31  ;;  %984 = vmatpush.msrb.mxu1 %v562_v32  ;;  %v731_v12 = vld [vmem:[%s1912_s23 + $0x758] sm:$0xff] }
  0xee   : > { %1004 = vmatpush.msrb.mxu2 %v638_v33  ;;  %1027 = vmatpush.msrb.mxu3 %v702_v34  ;;  %v523_v13 = vld [vmem:[%s1912_s23 + $0xd8] sm:$0xff] }
  0xef   : > { %1038 = vmatpush.msra.mxu0 %v559_v37  ;;  %1061 = vmatpush.msra.mxu1 %v623_v38  ;;  %v587_v14 = vld [vmem:[%s1912_s23 + $0x2d8] sm:$0xff] }
  0xf0   : > { %962 = vmatmul.f32.vlgmr.msrb.gmra.mxu0 %v2054_v17  ;;  %985 = vmatmul.f32.vlgmr.msrb.gmra.mxu1 %v2056_v18  ;;  %v663_v15 = vld [vmem:[%s1912_s23 + $0x538] sm:$0xff] }
  0xf1   : > { %1005 = vmatpush.msrb.mxu2 %v634_v41  ;;  %1028 = vmatpush.msrb.mxu3 %v698_v42  ;;  %v727_v16 = vld [vmem:[%s1912_s23 + $0x738] sm:$0xff] }
  0xf2   : > { %1039 = vmatpush.msra.mxu0 %v555_v43  ;;  %1062 = vmatpush.msra.mxu1 %v619_v44  ;;  %v519_v19 = vld [vmem:[%s1912_s23 + $0xb8] sm:$0xff] }
  0xf3   : > { %1006 = vmatpush.msrb.mxu2 %v630_v45  ;;  %1029 = vmatpush.msrb.mxu3 %v694_v46  ;;  %v583_v20 = vld [vmem:[%s1912_s23 + $0x2b8] sm:$0xff] }
  0xf4   : > { %1040 = vmatpush.msra.mxu0 %v551_v47  ;;  %1063 = vmatpush.msra.mxu1 %v615_v48  ;;  %v659_v21 = vld [vmem:[%s1912_s23 + $0x518] sm:$0xff] }
  0xf5   : > { %1007 = vmatpush.msrb.mxu2 %v626_v49  ;;  %1030 = vmatpush.msrb.mxu3 %v690_v50  ;;  %v723_v22 = vld [vmem:[%s1912_s23 + $0x718] sm:$0xff] }
  0xf6   : > { %1041 = vmatpush.msra.mxu0 %v547_v51  ;;  %1064 = vmatpush.msra.mxu1 %v611_v52  ;;  %v515_v23 = vld [vmem:[%s1912_s23 + $0x98] sm:$0xff] }
  0xf7   : > { %1084 = vmatpush.msra.mxu2 %v687_v53  ;;  %1107 = vmatpush.msra.mxu3 %v751_v54  ;;  %v579_v24 = vld [vmem:[%s1912_s23 + $0x298] sm:$0xff] }
  0xf8   : > { %1008 = vmatmul.f32.vlgmr.msrb.gmra.mxu2 %v2066_v35  ;;  %1031 = vmatmul.f32.vlgmr.msrb.gmra.mxu3 %v2068_v36  ;;  %v655_v25 = vld [vmem:[%s1912_s23 + $0x4f8] sm:$0xff] }
  0xf9   : > { %1042 = vmatpush.msra.mxu0 %v543_v55  ;;  %1065 = vmatpush.msra.mxu1 %v607_v56  ;;  %v719_v26 = vld [vmem:[%s1912_s23 + $0x6f8] sm:$0xff] }
  0xfa   : > { %1085 = vmatpush.msra.mxu2 %v683_v59  ;;  %1108 = vmatpush.msra.mxu3 %v747_v60  ;;  %v511_v27 = vld [vmem:[%s1912_s23 + $0x78] sm:$0xff] }
  0xfb   : > { %965 = vmatmul.f32.gmra.mxu0 %v2072_v39  ;;  %988 = vmatmul.f32.gmra.mxu1 %v2074_v40  ;;  %v575_v28 = vld [vmem:[%s1912_s23 + $0x278] sm:$0xff] }
  0xfc   : > { %1043 = vmatpush.msra.mxu0 %v539_v61  ;;  %1066 = vmatpush.msra.mxu1 %v603_v62  ;;  %v651_v29 = vld [vmem:[%s1912_s23 + $0x4d8] sm:$0xff] }
  0xfd   : > { %1086 = vmatpush.msra.mxu2 %v679_v63  ;;  %1109 = vmatpush.msra.mxu3 %v743_v0  ;;  %v715_v30 = vld [vmem:[%s1912_s23 + $0x6d8] sm:$0xff] }
  0xfe   : > { %1044 = vmatpush.msra.mxu0 %v535_v1  ;;  %1067 = vmatpush.msra.mxu1 %v599_v2  ;;  %v507_v31 = vld [vmem:[%s1912_s23 + $0x58] sm:$0xff] }
  0xff   : > { %1087 = vmatpush.msra.mxu2 %v675_v3  ;;  %1110 = vmatpush.msra.mxu3 %v739_v4  ;;  %v571_v32 = vld [vmem:[%s1912_s23 + $0x258] sm:$0xff] }
 0x100   : > { %1045 = vmatpush.msra.mxu0 %v531_v5  ;;  %1068 = vmatpush.msra.mxu1 %v595_v6  ;;  %v647_v33 = vld [vmem:[%s1912_s23 + $0x4b8] sm:$0xff] }
 0x101   : > { %1088 = vmatpush.msra.mxu2 %v671_v7  ;;  %1111 = vmatpush.msra.mxu3 %v735_v8  ;;  %v711_v34 = vld [vmem:[%s1912_s23 + $0x6b8] sm:$0xff] }
 0x102   : > { %1011 = vmatmul.f32.gmra.mxu2 %v2092_v57  ;;  %1034 = vmatmul.f32.gmra.mxu3 %v2094_v58  ;;  %v503_v37 = vld [vmem:[%s1912_s23 + $0x38] sm:$0xff] }
 0x103   : > { %1046 = vmatpush.msra.mxu0 %v527_v9  ;;  %1069 = vmatpush.msra.mxu1 %v591_v10  ;;  %v567_v38 = vld [vmem:[%s1912_s23 + $0x238] sm:$0xff] }
 0x104   : > { %1089 = vmatpush.msra.mxu2 %v667_v11  ;;  %1112 = vmatpush.msra.mxu3 %v731_v12  ;;  %v643_v41 = vld [vmem:[%s1912_s23 + $0x498] sm:$0xff] }
 0x105   : > { %1047 = vmatpush.msra.mxu0 %v523_v13  ;;  %1070 = vmatpush.msra.mxu1 %v587_v14  ;;  %v707_v42 = vld [vmem:[%s1912_s23 + $0x698] sm:$0xff] }
 0x106   : > { %1090 = vmatpush.msra.mxu2 %v663_v15  ;;  %1113 = vmatpush.msra.mxu3 %v727_v16  ;;  %v499_v43 = vld [vmem:[%s1912_s23 + $0x18] sm:$0xff] }
 0x107   : > { %1048 = vmatpush.msra.mxu0 %v519_v19  ;;  %1071 = vmatpush.msra.mxu1 %v583_v20  ;;  %v563_v44 = vld [vmem:[%s1912_s23 + $0x218] sm:$0xff] }
 0x108   : > { %1091 = vmatpush.msra.mxu2 %v659_v21  ;;  %1114 = vmatpush.msra.mxu3 %v723_v22  ;;  %v639_v45 = vld [vmem:[%s1912_s23 + $0x478] sm:$0xff] }
 0x109   : > { %1049 = vmatpush.msra.mxu0 %v515_v23  ;;  %1072 = vmatpush.msra.mxu1 %v579_v24  ;;  %v703_v46 = vld [vmem:[%s1912_s23 + $0x678] sm:$0xff] }
 0x10a   : > { %1092 = vmatpush.msra.mxu2 %v655_v25  ;;  %1115 = vmatpush.msra.mxu3 %v719_v26  ;;  %v635_v47 = vld [vmem:[%s1912_s23 + $0x458] sm:$0xff] }
 0x10b   : > { %1050 = vmatpush.msra.mxu0 %v511_v27  ;;  %1073 = vmatpush.msra.mxu1 %v575_v28  ;;  %v699_v48 = vld [vmem:[%s1912_s23 + $0x658] sm:$0xff] }
 0x10c   : > { %1093 = vmatpush.msra.mxu2 %v651_v29  ;;  %1116 = vmatpush.msra.mxu3 %v715_v30  ;;  %v631_v49 = vld [vmem:[%s1912_s23 + $0x438] sm:$0xff] }
 0x10d   : > { %1051 = vmatpush.msra.mxu0 %v507_v31  ;;  %1074 = vmatpush.msra.mxu1 %v571_v32  ;;  %v695_v50 = vld [vmem:[%s1912_s23 + $0x638] sm:$0xff] }
 0x10e   : > { %1094 = vmatpush.msra.mxu2 %v647_v33  ;;  %1117 = vmatpush.msra.mxu3 %v711_v34  ;;  %v627_v51 = vld [vmem:[%s1912_s23 + $0x418] sm:$0xff] }
 0x10f   : > { %1052 = vmatpush.msra.mxu0 %v503_v37  ;;  %1075 = vmatpush.msra.mxu1 %v567_v38  ;;  %v691_v52 = vld [vmem:[%s1912_s23 + $0x618] sm:$0xff] }
 0x110   : > { %1095 = vmatpush.msra.mxu2 %v643_v41  ;;  %1118 = vmatpush.msra.mxu3 %v707_v42 }
 0x111   : > { %1053 = vmatpush.msra.mxu0 %v499_v43  ;;  %1076 = vmatpush.msra.mxu1 %v563_v44 }
 0x112   : > { %1096 = vmatpush.msra.mxu2 %v639_v45  ;;  %1119 = vmatpush.msra.mxu3 %v703_v46 }
 0x113   : > { %1054 = vmatmul.f32.vlgmr.msra.gmra.mxu0 %v2054_v17  ;;  %1077 = vmatmul.f32.vlgmr.msra.gmra.mxu1 %v2056_v18  ;;  %v2231_v17 = vld [vmem:[%s318_s26] sm:$0xf] }
 0x114   : > { %1097 = vmatpush.msra.mxu2 %v635_v47  ;;  %1120 = vmatpush.msra.mxu3 %v699_v48  ;;  %v754_v18 = vperm.slane %v2231_v17, 0  ;;  %v755_v63 = vperm.slane %v2231_v17, 1  ;;  %v756_v29 = vperm.slane %v2231_v17, 2 }
 0x116   : > { %1098 = vmatpush.msra.mxu2 %v631_v49  ;;  %1121 = vmatpush.msra.mxu3 %v695_v50 }
 0x118   : > { %1099 = vmatpush.msra.mxu2 %v627_v51  ;;  %1122 = vmatpush.msra.mxu3 %v691_v52 }
 0x119   : > { %1100 = vmatmul.f32.vlgmr.msra.gmra.mxu2 %v2066_v35  ;;  %1123 = vmatmul.f32.vlgmr.msra.gmra.mxu3 %v2068_v36 }
 0x11b   : > { %1057 = vmatmul.f32.gmra.mxu0 %v2072_v39  ;;  %1080 = vmatmul.f32.gmra.mxu1 %v2074_v40 }
 0x121   : > { %1103 = vmatmul.f32.gmra.mxu2 %v2092_v57  ;;  %1126 = vmatmul.f32.gmra.mxu3 %v2094_v58 }
 0x144   : > { %v779_v53 = vpop.f32.mrf.mxu0  ;;  %v802_v35 = vpop.f32.mrf.mxu1 }
 0x145   : > { %v780_v54 = vadd.f32 %v779_v53, %v754_v18 }
 0x147   : > { %v803_v55 = vadd.f32 %v802_v35, %v780_v54 }
 0x14e   : > { %v782_v39 = vpop.f32.mrf.mxu0  ;;  %v805_v61 = vpop.f32.mrf.mxu1 }
 0x14f   : > { %v783_v40 = vadd.f32 %v782_v39, %v754_v18 }
 0x151   : > { %v825_v36 = vpop.f32.mrf.mxu2  ;;  %v848_v59 = vpop.f32.mrf.mxu3  ;;  %v806_v58 = vadd.f32 %v805_v61, %v783_v40  ;;  %v757_v61 = vperm.slane %v2231_v17, 3 }
 0x152   : > { %v826_v56 = vadd.f32 %v825_v36, %v803_v55 }
 0x154   : > { %v849_v60 = vadd.f32 %v848_v59, %v826_v56 }
 0x156   : > { %v1130_v57 = vmul.f32 0.5, %v849_v60 }
 0x158   : > { %1470 = vtanh.f32 %v1130_v57  ;;  %v871_v1 = vpop.f32.mrf.mxu0  ;;  %v894_v9 = vpop.f32.mrf.mxu1 }
 0x159   : > { %v872_v6 = vadd.f32 %v871_v1, %v755_v63 }
 0x15b   : > { %v828_v62 = vpop.f32.mrf.mxu2  ;;  %v851_v2 = vpop.f32.mrf.mxu3  ;;  %v895_v10 = vadd.f32 %v894_v9, %v872_v6 }
 0x15c   : > { %v829_v0 = vadd.f32 %v828_v62, %v806_v58 }
 0x15e   : > { %v1471_v3 = vpop.eup %1470  ;;  %v852_v4 = vadd.f32 %v851_v2, %v829_v0 }
 0x15f   : > { %v1146_v5 = vmul.f32 0.5, %v1471_v3 }
 0x160   : > { %v1134_v7 = vmul.f32 0.5, %v852_v4 }
 0x161   : > { %v1154_v8 = vadd.f32 0.5, %v1146_v5 }
 0x162   : > { %1472 = vtanh.f32 %v1134_v7  ;;  %v874_v19 = vpop.f32.mrf.mxu0  ;;  %v897_v23 = vpop.f32.mrf.mxu1 }
 0x163   : > { %1162 = vst [vmem:[%s2236_s9] sm:$0xff] %v1154_v8  ;;  %v875_v20 = vadd.f32 %v874_v19, %v755_v63 }
 0x165   : > { %v917_v11 = vpop.f32.mrf.mxu2  ;;  %v940_v13 = vpop.f32.mrf.mxu3  ;;  %v898_v24 = vadd.f32 %v897_v23, %v875_v20 }
 0x166   : > { %v918_v12 = vadd.f32 %v917_v11, %v895_v10 }
 0x168   : > { %v1473_v14 = vpop.eup %1472  ;;  %v941_v15 = vadd.f32 %v940_v13, %v918_v12 }
 0x169   : > { %v1150_v16 = vmul.f32 0.5, %v1473_v14 }
 0x16a   : > { %v1131_v21 = vmul.f32 0.5, %v941_v15 }
 0x16b   : > { %v1158_v22 = vadd.f32 0.5, %v1150_v16 }
 0x16c   : > { %1474 = vtanh.f32 %v1131_v21 }
 0x16d   : > { %1166 = vst [vmem:[%s2236_s9 + $0x20] sm:$0xff] %v1158_v22  ;;  %v963_v32 = vpop.f32.mrf.mxu0  ;;  %v986_v38 = vpop.f32.mrf.mxu1 }
 0x16e   : > { %v964_v37 = vadd.f32 %v963_v32, %v756_v29 }
 0x16f   : > { %v920_v25 = vpop.f32.mrf.mxu2  ;;  %v943_v27 = vpop.f32.mrf.mxu3 }
 0x170   : > { %v921_v26 = vadd.f32 %v920_v25, %v898_v24  ;;  %v987_v41 = vadd.f32 %v986_v38, %v964_v37 }
 0x172   : > { %v1475_v28 = vpop.eup %1474  ;;  %v944_v30 = vadd.f32 %v943_v27, %v921_v26 }
 0x173   : > { %v1147_v31 = vmul.f32 0.5, %v1475_v28 }
 0x174   : > { %v1135_v33 = vmul.f32 0.5, %v944_v30 }
 0x175   : > { %v1155_v34 = vadd.f32 0.5, %v1147_v31 }
 0x176   : > { %1476 = vtanh.f32 %v1135_v33 }
 0x177   : > { %1163 = vst [vmem:[%s2236_s9 + $0x8] sm:$0xff] %v1155_v34 }
 0x178   : > { %v966_v46 = vpop.f32.mrf.mxu0  ;;  %v989_v52 = vpop.f32.mrf.mxu1 }
 0x179   : > { %v967_v50 = vadd.f32 %v966_v46, %v756_v29 }
 0x17b   : > { %v1009_v42 = vpop.f32.mrf.mxu2  ;;  %v1032_v47 = vpop.f32.mrf.mxu3  ;;  %v990_v18 = vadd.f32 %v989_v52, %v967_v50 }
 0x17c   : > { %v1477_v43 = vpop.eup %1476  ;;  %v1010_v44 = vadd.f32 %v1009_v42, %v987_v41 }
 0x17d   : > { %v1151_v45 = vmul.f32 0.5, %v1477_v43 }
 0x17e   : > { %v1033_v48 = vadd.f32 %v1032_v47, %v1010_v44 }
 0x17f   : > { %v1159_v49 = vadd.f32 0.5, %v1151_v45 }
 0x180   : > { %v1132_v51 = vmul.f32 0.5, %v1033_v48 }
 0x181   : > { %1167 = vst [vmem:[%s2236_s9 + $0x28] sm:$0xff] %v1159_v49 }
 0x182   : > { %1478 = vtanh.f32 %v1132_v51 }
 0x185   : > { %v1012_v53 = vpop.f32.mrf.mxu2  ;;  %v1035_v35 = vpop.f32.mrf.mxu3 }
 0x186   : > { %v1013_v54 = vadd.f32 %v1012_v53, %v990_v18 }
 0x188   : > { %v1479_v55 = vpop.eup %1478  ;;  %v1036_v36 = vadd.f32 %v1035_v35, %v1013_v54 }
 0x189   : > { %v1148_v56 = vmul.f32 0.5, %v1479_v55 }
 0x18a   : > { %v1136_v39 = vmul.f32 0.5, %v1036_v36 }
 0x18b   : > { %v1156_v59 = vadd.f32 0.5, %v1148_v56 }
 0x18c   : > { %1480 = vtanh.f32 %v1136_v39 }
 0x18d   : > { %1164 = vst [vmem:[%s2236_s9 + $0x10] sm:$0xff] %v1156_v59 }
 0x190   : > { %v1055_v40 = vpop.f32.mrf.mxu0  ;;  %v1078_v63 = vpop.f32.mrf.mxu1 }
 0x191   : > { %v1056_v62 = vadd.f32 %v1055_v40, %v757_v61 }
 0x192   : > { %v1481_v60 = vpop.eup %1480 }
 0x193   : > { %v1152_v57 = vmul.f32 0.5, %v1481_v60  ;;  %v1079_v0 = vadd.f32 %v1078_v63, %v1056_v62 }
 0x195   : > { %v1160_v58 = vadd.f32 0.5, %v1152_v57 }
 0x197   : > { %1168 = vst [vmem:[%s2236_s9 + $0x30] sm:$0xff] %v1160_v58 }
 0x198   : > { %v1058_v1 = vpop.f32.mrf.mxu0  ;;  %v1081_v8 = vpop.f32.mrf.mxu1 }
 0x199   : > { %v1059_v5 = vadd.f32 %v1058_v1, %v757_v61 }
 0x19b   : > { %v1082_v9 = vadd.f32 %v1081_v8, %v1059_v5 }
 0x19c   : > { %v1101_v2 = vpop.f32.mrf.mxu2  ;;  %v1124_v3 = vpop.f32.mrf.mxu3 }
 0x19d   : > { %v1102_v4 = vadd.f32 %v1101_v2, %v1079_v0 }
 0x19f   : > { %v1125_v6 = vadd.f32 %v1124_v3, %v1102_v4 }
 0x1a1   : > { %v1133_v7 = vmul.f32 0.5, %v1125_v6 }
 0x1a3   : > { %1482 = vtanh.f32 %v1133_v7 }
 0x1a4   : > { %v1104_v10 = vpop.f32.mrf.mxu2  ;;  %v1127_v11 = vpop.f32.mrf.mxu3 }
 0x1a5   : > { %v1105_v17 = vadd.f32 %v1104_v10, %v1082_v9 }
 0x1a7   : > { %v1128_v12 = vadd.f32 %v1127_v11, %v1105_v17 }
 0x1a9   : > { %v1483_v13 = vpop.eup %1482  ;;  %v1137_v14 = vmul.f32 0.5, %v1128_v12 }
 0x1aa   : > { %v1149_v15 = vmul.f32 0.5, %v1483_v13 }
 0x1ab   : > { %1484 = vtanh.f32 %v1137_v14 }
 0x1ac   : > { %v1157_v16 = vadd.f32 0.5, %v1149_v15 }
 0x1ae   : > { %1165 = vst [vmem:[%s2236_s9 + $0x18] sm:$0xff] %v1157_v16 }
 0x1b1   : > { %v1485_v19 = vpop.eup %1484 }
 0x1b2   : > { %v1153_v20 = vmul.f32 0.5, %v1485_v19 }
 0x1b4   : > { %v1161_v21 = vadd.f32 0.5, %v1153_v20 }
 0x1b6   : > { %1169 = vst [vmem:[%s2236_s9 + $0x38] sm:$0xff] %v1161_v21 }
 0x1b7   : > { %1663 = shalt.err (!%p1660_p0)
}
 0x1b8   : > { %s1736_s29 = smov 512   ;;  %s1737_s1 = smov 1024  }
 0x1b9   : > { %s1738_s0 = smov 32  }
 0x1ba   : > { %1380 = dma.vmem_to_hbm [thread:$0]  (%p1853_p5), %s1187_s7, 1024, %s1189_s8, %s1171_s12, %s1736_s29, %s1737_s1, %s1738_s0  }
 0x1bb PF: > { %s2322_s3 = sld [smem:[#allocation16_spill]]  ;;  %p1400_p3 = pnand %p1332_p11, %p1814_p6 }
 0x1bc   : > { %s2324_s20 = sld [smem:[#allocation18_spill]] }
 0x1bd   : > { %p1401_p7 = pneg %p1400_p3 }
 0x1c1   : > { %s1203_s23 = sand.u32 1, %s2322_s3  }
 0x1c2   : > { %s1204_s24 = scalar_lea.sflag [#allocation4], %s1203_s23 }
 0x1c3   : > { %1701 = dma.done.wait (%p1401_p7), %s1204_s24, 1024  }
 0x1c4   : > { %1703 = vsyncadd (%p1401_p7), %s1204_s24, 4294966272  ;;  %s23_s23 = sadd.s32 1, %s2324_s20   ;;  %s2325_s26 = sld [smem:[#allocation17_spill]] }
 0x1c5   : > { %p20_p9 = scmp.ge.s32.totalorder %s23_s23, 4   ;;  %s2326_s20 = sld [smem:[#allocation21_spill]] }
 0x1c6   : > { %s2327_s15 = sld [smem:[#allocation20_spill]]  ;;  %s2328_s18 = smov %s1710_s19 }
 0x1c7   : > { %s2330_s21 = smov %s1722_s22 }
 0x1c8   :  { %22 = sbr.rel (!%p20_p9) target bundleno = 12 (0xc), region = 110 }
 0x1ca   : > { %s2329_s19 = smov %s2325_s26 }
 0x1cc   : > { %s2331_s22 = smov %s2327_s15 }
 0x1cd   :  { %1210 = vsyncpa [#allocation3], 1 }
 0x1ce   :  { %1212 = vsyncpa [#allocation3 + $0x1], 1 }
 0x1cf   :  { %1213 = vsyncpa [#allocation6], 1 }
 0x1d0   :  { %1214 = vsyncpa [#allocation9], 1 }
 0x1d1   :  { %1216 = vsyncpa [#allocation9 + $0x1], 1 }
 0x1d2   :  { %1217 = vsyncpa [#allocation4], 1 }
 0x1d3   :  { %1219 = vsyncpa [#allocation4 + $0x1], 1 }

</bundles_post_ra>
